<compile_context>
chip_gen: v6e
topology: v6e:2x2x1
jax: 0.10.0
libtpu: 0.0.40
codegen_flags: <defaults>
</compile_context>

<pallas_src>
import functools

import jax
import jax.numpy as jnp
from jax import lax
from jax.experimental import pallas as pl
from jax.experimental.pallas import tpu as pltpu

NNType = "GIN"                 # mirror of the module-level global in the PyTorch script
MATMUL_DTYPE = jnp.bfloat16    # MXU-native operand dtype on v5e/v6e/v7x
BN_EPS = 1e-5

# Raise the scoped-VMEM limit above the defaults (16 MiB v5e / 32 MiB v6e,v7x)
# so whole-array residency keeps fitting at moderate N.  64 MiB is within
# physical VMEM on every current chip; re-derive (leave headroom) when tiling.
_VMEM_LIMIT_BYTES = 64 * 1024 * 1024

_VMEM = pl.BlockSpec(memory_space=pltpu.MemorySpace.VMEM)
_SMEM = pl.BlockSpec(memory_space=pltpu.MemorySpace.SMEM)


# ---------------- in-kernel helpers (f32 VPU/EUP math) ----------------

def _act(x, act):
    if act == "relu":
        return jnp.maximum(x, 0.0)
    if act == "sigmoid":
        return jax.nn.sigmoid(x)
    return x


def _bn(x):
    # nn.BatchNorm1d training-mode normalization: batch statistics (biased
    # variance), default affine gamma=1 / beta=0.  Single-pass stats:
    # var = E[x^2] - mean^2 (clamped at 0); rsqrt lands on the EUP slot.
    n = x.shape[0]
    s = jnp.sum(x, axis=0, keepdims=True)
    sq = jnp.sum(x * x, axis=0, keepdims=True)
    mean = s * (1.0 / n)
    var = jnp.maximum(sq * (1.0 / n) - mean * mean, 0.0)
    return (x - mean) * lax.rsqrt(var + BN_EPS)


def _mm(a, b):
    # MXU matmul: bf16 operands (weights are pre-cast in the wrapper),
    # f32 accumulation.
    return jnp.dot(a.astype(MATMUL_DTYPE), b.astype(MATMUL_DTYPE),
                   preferred_element_type=jnp.float32)


# ---------------- fused GIN-stack kernel (whole GIN.forward) ----------------

def _gin_forward_kernel(*refs, n_blocks, n_layers, act):
    """Ref layout:
       adj,
       h_block_0 .. h_block_{n_blocks-1},
       layer 0:   w0_part_0 .. w0_part_{n_blocks-1}, b0, w1, b1, wcomp_0,
       layer l>0: w0, b0, w1, b1, wcomp_l,
       bcomp, out_ref
    """
    adj_ref = refs[0]
    h_refs = refs[1:1 + n_blocks]
    idx = 1 + n_blocks

    adj = adj_ref[...]            # already MATMUL_DTYPE (cast once in the wrapper)
    h = None                      # (N, H) f32 after the first layer
    acc = None                    # split-K accumulator for linearcomp
    for l in range(n_layers):     # static unroll; intermediates stay in VMEM/vregs
        if l == 0:
            w0_parts = refs[idx:idx + n_blocks]
            idx += n_blocks
        else:
            w0_parts = (refs[idx],)
            idx += 1
        b0_ref, w1_ref, b1_ref, wcomp_ref = refs[idx:idx + 4]
        idx += 4

        blocks = [r[...] for r in h_refs] if l == 0 else [h]

        # GINConv (neighbor_pooling='sum', eps=0, learn_eps=False):
        #   (1 + eps) * h + sum_{j in N(i)} h_j  ==  h + A @ h
        # First layer: the input concat is fused by splitting A@g0 and W0 into
        # per-block pieces:  agg @ W0 == sum_b (h_b + A@h_b) @ W0_b
        t = b0_ref[...]
        for hb, w0p in zip(blocks, w0_parts):
            aggb = hb + jnp.dot(adj, hb.astype(MATMUL_DTYPE),
                                preferred_element_type=jnp.float32)
            t = t + _mm(aggb, w0p[...])

        t = _act(_bn(t), act)                 # MLP: act(BN(lin0(.)))
        t = _mm(t, w1_ref[...]) + b1_ref[...]  # MLP linear 1 (linear output)
        t = jax.nn.sigmoid(_bn(t))            # ApplyNodeFunc: sigmoid(BN(mlp(h)))
        h = _act(_bn(t), act)                 # GIN outer: act(BN(h))

        # linearcomp over concat(ll) as split-K accumulation (no HBM concat);
        # wcomp is pre-split per layer in the wrapper (no full-wcomp live range).
        contrib = _mm(h, wcomp_ref[...])
        acc = contrib if acc is None else acc + contrib

    bcomp_ref, out_ref = refs[idx], refs[idx + 1]
    out_ref[...] = acc + bcomp_ref[...]


def gin_forward(params, adj_bf16, h_blocks, activation):
    """h_blocks: list of (N, d_b) f32 feature blocks; the stack consumes their
    (virtual) concatenation as the input features."""
    n_layers = len(params["layers"])
    hidden_dim = params["layers"][0][1]["w"].shape[0]      # lin1: (H, H)
    out_dim = params["linearcomp"]["w"].shape[1]
    n = h_blocks[0].shape[0]
    block_dims = tuple(int(b.shape[1]) for b in h_blocks)

    args = [adj_bf16, *h_blocks]
    for l, (lin0, lin1) in enumerate(params["layers"]):
        w0 = lin0["w"].astype(MATMUL_DTYPE)
        if l == 0:
            # pre-split layer-0 weight rows per input block (fused concat)
            off = 0
            for d in block_dims:
                args.append(w0[off:off + d, :])
                off += d
        else:
            args.append(w0)
        args.append(lin0["b"])
        args.append(lin1["w"].astype(MATMUL_DTYPE))
        args.append(lin1["b"])
        wcomp = params["linearcomp"]["w"].astype(MATMUL_DTYPE)
        args.append(wcomp[l * hidden_dim:(l + 1) * hidden_dim, :])
    args.append(params["linearcomp"]["b"])

    # Advisory cost estimate for the XLA scheduler.
    d = sum(block_dims)
    flops = 0
    for _ in range(n_layers):
        flops += 2 * n * n * d                       # A @ h
        flops += 2 * n * d * hidden_dim              # lin0
        flops += 2 * n * hidden_dim * hidden_dim     # lin1
        flops += 2 * n * hidden_dim * out_dim        # linearcomp split-K
        d = hidden_dim
    transcendentals = n_layers * n * hidden_dim * 5  # 3 rsqrt + sigmoid(s), rough
    bytes_accessed = int(sum(int(a.size) * a.dtype.itemsize for a in args)
                         + n * out_dim * 4)

    kernel = functools.partial(_gin_forward_kernel, n_blocks=len(h_blocks),
                               n_layers=n_layers, act=activation)
    return pl.pallas_call(
        kernel,
        out_shape=jax.ShapeDtypeStruct((n, out_dim), jnp.float32),
        in_specs=[_VMEM] * len(args),
        out_specs=_VMEM,
        compiler_params=pltpu.CompilerParams(vmem_limit_bytes=_VMEM_LIMIT_BYTES),
        cost_estimate=pl.CostEstimate(flops=int(flops),
                                      transcendentals=int(transcendentals),
                                      bytes_accessed=bytes_accessed),
    )(*args)


# ---------------- fused head kernel (gather + concat + MLP + final act) ----------------

def _head_kernel(ids1_ref, ids_ref, g1_ref, v_ref,
                 w0_top_ref, w0_bot_ref, b0_ref, w1_ref, b1_ref,
                 o_ref, g1s_scr, vs_scr, *, act_mlp, act_train):
    m = g1s_scr.shape[0]
    # Real row gather: ids live in SMEM (scalar reads), each row is one dynamic
    # sublane-offset VMEM load into scratch (exact f32, no one-hot matmuls).
    for i in range(m):                                   # static unroll; m is small
        g1s_scr[pl.ds(i, 1), :] = g1_ref[pl.ds(ids1_ref[i], 1), :]
        vs_scr[pl.ds(i, 1), :] = v_ref[pl.ds(ids_ref[i], 1), :]
    # cat((g1[ids1], v[ids]), 1) @ W0  ==  g1[ids1] @ W0_top + v[ids] @ W0_bot
    t = (_mm(g1s_scr[...], w0_top_ref[...])
         + _mm(vs_scr[...], w0_bot_ref[...])
         + b0_ref[...])
    t = _act(_bn(t), act_mlp)                            # MLP: act(BN(lin0(.)))
    g3 = _mm(t, w1_ref[...]) + b1_ref[...]               # MLP linear output
    o_ref[...] = _act(g3, act_train)                     # final activationTrain


# ---------------- Parameter init (deterministic, torch-style uniform) ----------------

def linear_params(key, din, dout):
    kw, kb = jax.random.split(key)
    bound = 1.0 / float(din) ** 0.5
    w = jax.random.uniform(kw, (din, dout), jnp.float32, -bound, bound)
    b = jax.random.uniform(kb, (1, dout), jnp.float32, -bound, bound)
    return {"w": w, "b": b}


def init_gin_params(key, num_layers, input_dim, hidden_dim, output_dim):
    # Each GIN layer holds a 2-layer MLP (num_mlp_layers=2); BNs use default
    # affine (gamma=1, beta=0) so they carry no explicit parameters here.
    keys = jax.random.split(key, 2 * (num_layers - 1) + 1)
    layers = []
    d_in = input_dim
    for l in range(num_layers - 1):
        lin0 = linear_params(keys[2 * l], d_in, hidden_dim)
        lin1 = linear_params(keys[2 * l + 1], hidden_dim, hidden_dim)
        layers.append((lin0, lin1))
        d_in = hidden_dim
    linearcomp = linear_params(keys[-1], (num_layers - 1) * hidden_dim, output_dim)
    return {"layers": layers, "linearcomp": linearcomp}


# ---------------- Forward pass ----------------

def training_forward(params, adjacency_matrix, degree, features, hashFeatures, ids, ids1, acts):
    # Adjacency fed to all kernels already in the matmul dtype (0/1 values are
    # exact in bf16); cast once in the wrapper, reused by both GIN stacks.
    adj = adjacency_matrix.astype(MATMUL_DTYPE)

    # v = self.gin(adjacency_matrix, degree)          -- one fused pallas_call
    v = gin_forward(params["gin"], adj, [degree], acts["activation1"])

    # g0 = cat((v, hashFeatures, features), 1); g1 = self.gnn(adjacency_matrix, g0)
    #   -- the concat is fused into the gnn kernel (split-weight first layer),
    #      so g0 never materializes in HBM.
    g1 = gin_forward(params["gnn"], adj, [v, hashFeatures, features], acts["activation2"])

    # g2 = cat((g1[ids1], v[ids]), 1); g3 = self.mlp(g2); activationTrain(g3)
    #   -- one fused pallas_call: SMEM ids + dynamic-row gather + split-weight
    #      concat + lin0 + BN + act + lin1 + final activation.
    m = params["mlp"]
    hidden_dim = v.shape[1]
    num_ids = ids.shape[0]
    out_dim = m["lin1"]["w"].shape[1]
    w0 = m["lin0"]["w"].astype(MATMUL_DTYPE)
    w0_top, w0_bot = w0[:hidden_dim, :], w0[hidden_dim:, :]

    kernel = functools.partial(_head_kernel,
                               act_mlp=acts["activationMLP"],
                               act_train=acts["activationTrain"])
    return pl.pallas_call(
        kernel,
        out_shape=jax.ShapeDtypeStruct((num_ids, out_dim), jnp.float32),
        in_specs=[_SMEM, _SMEM] + [_VMEM] * 7,
        out_specs=_VMEM,
        scratch_shapes=[pltpu.VMEM((num_ids, hidden_dim), jnp.float32),
                        pltpu.VMEM((num_ids, hidden_dim), jnp.float32)],
        compiler_params=pltpu.CompilerParams(vmem_limit_bytes=_VMEM_LIMIT_BYTES),
    )(ids1.astype(jnp.int32), ids.astype(jnp.int32),
      g1, v,
      w0_top, w0_bot, m["lin0"]["b"],
      m["lin1"]["w"].astype(MATMUL_DTYPE), m["lin1"]["b"])


if __name__ == "__main__":
    key = jax.random.PRNGKey(0)

    # Small shapes consistent with the module's forward
    N = 16            # number of nodes
    M = 8             # len(ids) == len(ids1)
    nGINlayers = 3
    nGNNlayers = 3
    featuresdim = 8
    degreedim = 8
    hashdim = 8
    hiddendim = 32
    activation1, activation2 = "sigmoid", "relu"
    activationMLP, activationTrain = "relu", "sigmoid"

    k_adj, k_deg, k_feat, k_hash, k_ids, k_ids1, k_p = jax.random.split(key, 7)

    # symmetric 0/1 adjacency without self loops
    upper = (jax.random.uniform(k_adj, (N, N)) < 0.3).astype(jnp.float32)
    upper = jnp.triu(upper, 1)
    adjacency_matrix = upper + upper.T

    degree = jax.random.normal(k_deg, (N, degreedim), jnp.float32)
    features = jax.random.normal(k_feat, (N, featuresdim), jnp.float32)
    hashFeatures = jax.random.normal(k_hash, (N, hashdim), jnp.float32)
    ids = jax.random.randint(k_ids, (M,), 0, N)
    ids1 = jax.random.randint(k_ids1, (M,), 0, N)

    kg, kn, km0, km1 = jax.random.split(k_p, 4)
    params = {
        "gin": init_gin_params(kg, nGINlayers, degreedim, hiddendim, hiddendim),
        "gnn": init_gin_params(
            kn, nGNNlayers, hiddendim + hashdim + featuresdim, hiddendim, hiddendim
        ),
        "mlp": {
            "lin0": linear_params(km0, 2 * hiddendim, 2 * hiddendim),
            "lin1": linear_params(km1, 2 * hiddendim, featuresdim),
        },
    }
    acts = dict(
        activation1=activation1,
        activation2=activation2,
        activationMLP=activationMLP,
        activationTrain=activationTrain,
    )

    out = training_forward(
        params, adjacency_matrix, degree, features, hashFeatures, ids, ids1, acts
    )
    out = jax.block_until_ready(out)
    assert out.shape == (M, featuresdim), out.shape
    assert bool(jnp.all(jnp.isfinite(out)))
    print("KERNEL_OK")
</pallas_src>

<mosaic_0001>
module attributes {stable_mosaic.version = 11 : i64} {
  func.func @_gin_forward_kernel(%arg0: memref<16x16xbf16, #tpu.memory_space<vmem>>, %arg1: memref<16x8xf32, #tpu.memory_space<vmem>>, %arg2: memref<8x32xbf16, #tpu.memory_space<vmem>>, %arg3: memref<1x32xf32, #tpu.memory_space<vmem>>, %arg4: memref<32x32xbf16, #tpu.memory_space<vmem>>, %arg5: memref<1x32xf32, #tpu.memory_space<vmem>>, %arg6: memref<32x32xbf16, #tpu.memory_space<vmem>>, %arg7: memref<32x32xbf16, #tpu.memory_space<vmem>>, %arg8: memref<1x32xf32, #tpu.memory_space<vmem>>, %arg9: memref<32x32xbf16, #tpu.memory_space<vmem>>, %arg10: memref<1x32xf32, #tpu.memory_space<vmem>>, %arg11: memref<32x32xbf16, #tpu.memory_space<vmem>>, %arg12: memref<1x32xf32, #tpu.memory_space<vmem>>, %arg13: memref<16x32xf32, #tpu.memory_space<vmem>>) attributes {dimension_semantics = [], scalar_prefetch = 0 : i64, scratch_operands = 0 : i64, tpu.core_type = #tpu.core_type<tc>} {
    %c0 = arith.constant 0 : index
    %c0_0 = arith.constant 0 : index
    %0 = vector.load %arg0[%c0, %c0_0] : memref<16x16xbf16, #tpu.memory_space<vmem>>, vector<16x16xbf16>
    %c0_1 = arith.constant 0 : index
    %c0_2 = arith.constant 0 : index
    %1 = vector.load %arg1[%c0_1, %c0_2] : memref<16x8xf32, #tpu.memory_space<vmem>>, vector<16x8xf32>
    %c0_3 = arith.constant 0 : index
    %c0_4 = arith.constant 0 : index
    %2 = vector.load %arg3[%c0_3, %c0_4] : memref<1x32xf32, #tpu.memory_space<vmem>>, vector<1x32xf32>
    %3 = arith.truncf %1 : vector<16x8xf32> to vector<16x8xbf16>
    %cst = arith.constant dense<0.000000e+00> : vector<16x8xf32>
    %4 = tpu.matmul %0, %3, %cst {dimension_numbers = #tpu.dot_dimension_numbers<[1], [0], [0], [1], [0, 0, 1, 1], [], []>} : vector<16x16xbf16>, vector<16x8xbf16>, vector<16x8xf32> -> vector<16x8xf32>
    %5 = arith.addf %1, %4 : vector<16x8xf32>
    %c0_5 = arith.constant 0 : index
    %c0_6 = arith.constant 0 : index
    %6 = vector.load %arg2[%c0_5, %c0_6] : memref<8x32xbf16, #tpu.memory_space<vmem>>, vector<8x32xbf16>
    %7 = arith.truncf %5 : vector<16x8xf32> to vector<16x8xbf16>
    %cst_7 = arith.constant dense<0.000000e+00> : vector<16x32xf32>
    %8 = tpu.matmul %7, %6, %cst_7 {dimension_numbers = #tpu.dot_dimension_numbers<[1], [0], [0], [1], [0, 0, 1, 1], [], []>} : vector<16x8xbf16>, vector<8x32xbf16>, vector<16x32xf32> -> vector<16x32xf32>
    %9 = vector.broadcast %2 : vector<1x32xf32> to vector<16x32xf32>
    %10 = arith.addf %9, %8 : vector<16x32xf32>
    %cst_8 = arith.constant dense<0.000000e+00> : vector<32xf32>
    %11 = vector.multi_reduction <add>, %10, %cst_8 [0] : vector<16x32xf32> to vector<32xf32>
    %12 = vector.shape_cast %11 : vector<32xf32> to vector<1x32xf32>
    %13 = arith.mulf %10, %10 : vector<16x32xf32>
    %cst_9 = arith.constant dense<0.000000e+00> : vector<32xf32>
    %14 = vector.multi_reduction <add>, %13, %cst_9 [0] : vector<16x32xf32> to vector<32xf32>
    %15 = vector.shape_cast %14 : vector<32xf32> to vector<1x32xf32>
    %cst_10 = arith.constant 6.250000e-02 : f32
    %16 = vector.broadcast %cst_10 : f32 to vector<1x32xf32>
    %17 = arith.mulf %12, %16 : vector<1x32xf32>
    %cst_11 = arith.constant 6.250000e-02 : f32
    %18 = vector.broadcast %cst_11 : f32 to vector<1x32xf32>
    %19 = arith.mulf %15, %18 : vector<1x32xf32>
    %20 = arith.mulf %17, %17 : vector<1x32xf32>
    %21 = arith.subf %19, %20 : vector<1x32xf32>
    %cst_12 = arith.constant 0.000000e+00 : f32
    %22 = vector.broadcast %cst_12 : f32 to vector<1x32xf32>
    %23 = arith.maximumf %21, %22 : vector<1x32xf32>
    %24 = vector.broadcast %17 : vector<1x32xf32> to vector<16x32xf32>
    %25 = arith.subf %10, %24 : vector<16x32xf32>
    %cst_13 = arith.constant 9.99999974E-6 : f32
    %26 = vector.broadcast %cst_13 : f32 to vector<1x32xf32>
    %27 = arith.addf %23, %26 : vector<1x32xf32>
    %28 = math.rsqrt %27 : vector<1x32xf32>
    %29 = vector.broadcast %28 : vector<1x32xf32> to vector<16x32xf32>
    %30 = arith.mulf %25, %29 : vector<16x32xf32>
    %31 = arith.negf %30 : vector<16x32xf32>
    %32 = math.exp %31 : vector<16x32xf32>
    %cst_14 = arith.constant 1.000000e+00 : f32
    %33 = vector.broadcast %cst_14 : f32 to vector<16x32xf32>
    %34 = arith.addf %33, %32 : vector<16x32xf32>
    %35 = arith.divf %33, %34 : vector<16x32xf32>
    %c0_15 = arith.constant 0 : index
    %c0_16 = arith.constant 0 : index
    %36 = vector.load %arg4[%c0_15, %c0_16] : memref<32x32xbf16, #tpu.memory_space<vmem>>, vector<32x32xbf16>
    %37 = arith.truncf %35 : vector<16x32xf32> to vector<16x32xbf16>
    %cst_17 = arith.constant dense<0.000000e+00> : vector<16x32xf32>
    %38 = tpu.matmul %37, %36, %cst_17 {dimension_numbers = #tpu.dot_dimension_numbers<[1], [0], [0], [1], [0, 0, 1, 1], [], []>} : vector<16x32xbf16>, vector<32x32xbf16>, vector<16x32xf32> -> vector<16x32xf32>
    %c0_18 = arith.constant 0 : index
    %c0_19 = arith.constant 0 : index
    %39 = vector.load %arg5[%c0_18, %c0_19] : memref<1x32xf32, #tpu.memory_space<vmem>>, vector<1x32xf32>
    %40 = vector.broadcast %39 : vector<1x32xf32> to vector<16x32xf32>
    %41 = arith.addf %38, %40 : vector<16x32xf32>
    %cst_20 = arith.constant dense<0.000000e+00> : vector<32xf32>
    %42 = vector.multi_reduction <add>, %41, %cst_20 [0] : vector<16x32xf32> to vector<32xf32>
    %43 = vector.shape_cast %42 : vector<32xf32> to vector<1x32xf32>
    %44 = arith.mulf %41, %41 : vector<16x32xf32>
    %cst_21 = arith.constant dense<0.000000e+00> : vector<32xf32>
    %45 = vector.multi_reduction <add>, %44, %cst_21 [0] : vector<16x32xf32> to vector<32xf32>
    %46 = vector.shape_cast %45 : vector<32xf32> to vector<1x32xf32>
    %cst_22 = arith.constant 6.250000e-02 : f32
    %47 = vector.broadcast %cst_22 : f32 to vector<1x32xf32>
    %48 = arith.mulf %43, %47 : vector<1x32xf32>
    %cst_23 = arith.constant 6.250000e-02 : f32
    %49 = vector.broadcast %cst_23 : f32 to vector<1x32xf32>
    %50 = arith.mulf %46, %49 : vector<1x32xf32>
    %51 = arith.mulf %48, %48 : vector<1x32xf32>
    %52 = arith.subf %50, %51 : vector<1x32xf32>
    %cst_24 = arith.constant 0.000000e+00 : f32
    %53 = vector.broadcast %cst_24 : f32 to vector<1x32xf32>
    %54 = arith.maximumf %52, %53 : vector<1x32xf32>
    %55 = vector.broadcast %48 : vector<1x32xf32> to vector<16x32xf32>
    %56 = arith.subf %41, %55 : vector<16x32xf32>
    %cst_25 = arith.constant 9.99999974E-6 : f32
    %57 = vector.broadcast %cst_25 : f32 to vector<1x32xf32>
    %58 = arith.addf %54, %57 : vector<1x32xf32>
    %59 = math.rsqrt %58 : vector<1x32xf32>
    %60 = vector.broadcast %59 : vector<1x32xf32> to vector<16x32xf32>
    %61 = arith.mulf %56, %60 : vector<16x32xf32>
    %62 = arith.negf %61 : vector<16x32xf32>
    %63 = math.exp %62 : vector<16x32xf32>
    %cst_26 = arith.constant 1.000000e+00 : f32
    %64 = vector.broadcast %cst_26 : f32 to vector<16x32xf32>
    %65 = arith.addf %64, %63 : vector<16x32xf32>
    %66 = arith.divf %64, %65 : vector<16x32xf32>
    %cst_27 = arith.constant dense<0.000000e+00> : vector<32xf32>
    %67 = vector.multi_reduction <add>, %66, %cst_27 [0] : vector<16x32xf32> to vector<32xf32>
    %68 = vector.shape_cast %67 : vector<32xf32> to vector<1x32xf32>
    %69 = arith.mulf %66, %66 : vector<16x32xf32>
    %cst_28 = arith.constant dense<0.000000e+00> : vector<32xf32>
    %70 = vector.multi_reduction <add>, %69, %cst_28 [0] : vector<16x32xf32> to vector<32xf32>
    %71 = vector.shape_cast %70 : vector<32xf32> to vector<1x32xf32>
    %cst_29 = arith.constant 6.250000e-02 : f32
    %72 = vector.broadcast %cst_29 : f32 to vector<1x32xf32>
    %73 = arith.mulf %68, %72 : vector<1x32xf32>
    %cst_30 = arith.constant 6.250000e-02 : f32
    %74 = vector.broadcast %cst_30 : f32 to vector<1x32xf32>
    %75 = arith.mulf %71, %74 : vector<1x32xf32>
    %76 = arith.mulf %73, %73 : vector<1x32xf32>
    %77 = arith.subf %75, %76 : vector<1x32xf32>
    %cst_31 = arith.constant 0.000000e+00 : f32
    %78 = vector.broadcast %cst_31 : f32 to vector<1x32xf32>
    %79 = arith.maximumf %77, %78 : vector<1x32xf32>
    %80 = vector.broadcast %73 : vector<1x32xf32> to vector<16x32xf32>
    %81 = arith.subf %66, %80 : vector<16x32xf32>
    %cst_32 = arith.constant 9.99999974E-6 : f32
    %82 = vector.broadcast %cst_32 : f32 to vector<1x32xf32>
    %83 = arith.addf %79, %82 : vector<1x32xf32>
    %84 = math.rsqrt %83 : vector<1x32xf32>
    %85 = vector.broadcast %84 : vector<1x32xf32> to vector<16x32xf32>
    %86 = arith.mulf %81, %85 : vector<16x32xf32>
    %87 = arith.negf %86 : vector<16x32xf32>
    %88 = math.exp %87 : vector<16x32xf32>
    %cst_33 = arith.constant 1.000000e+00 : f32
    %89 = vector.broadcast %cst_33 : f32 to vector<16x32xf32>
    %90 = arith.addf %89, %88 : vector<16x32xf32>
    %91 = arith.divf %89, %90 : vector<16x32xf32>
    %c0_34 = arith.constant 0 : index
    %c0_35 = arith.constant 0 : index
    %92 = vector.load %arg6[%c0_34, %c0_35] : memref<32x32xbf16, #tpu.memory_space<vmem>>, vector<32x32xbf16>
    %93 = arith.truncf %91 : vector<16x32xf32> to vector<16x32xbf16>
    %cst_36 = arith.constant dense<0.000000e+00> : vector<16x32xf32>
    %94 = tpu.matmul %93, %92, %cst_36 {dimension_numbers = #tpu.dot_dimension_numbers<[1], [0], [0], [1], [0, 0, 1, 1], [], []>} : vector<16x32xbf16>, vector<32x32xbf16>, vector<16x32xf32> -> vector<16x32xf32>
    %c0_37 = arith.constant 0 : index
    %c0_38 = arith.constant 0 : index
    %95 = vector.load %arg8[%c0_37, %c0_38] : memref<1x32xf32, #tpu.memory_space<vmem>>, vector<1x32xf32>
    %96 = arith.truncf %91 : vector<16x32xf32> to vector<16x32xbf16>
    %cst_39 = arith.constant dense<0.000000e+00> : vector<16x32xf32>
    %97 = tpu.matmul %0, %96, %cst_39 {dimension_numbers = #tpu.dot_dimension_numbers<[1], [0], [0], [1], [0, 0, 1, 1], [], []>} : vector<16x16xbf16>, vector<16x32xbf16>, vector<16x32xf32> -> vector<16x32xf32>
    %98 = arith.addf %91, %97 : vector<16x32xf32>
    %c0_40 = arith.constant 0 : index
    %c0_41 = arith.constant 0 : index
    %99 = vector.load %arg7[%c0_40, %c0_41] : memref<32x32xbf16, #tpu.memory_space<vmem>>, vector<32x32xbf16>
    %100 = arith.truncf %98 : vector<16x32xf32> to vector<16x32xbf16>
    %cst_42 = arith.constant dense<0.000000e+00> : vector<16x32xf32>
    %101 = tpu.matmul %100, %99, %cst_42 {dimension_numbers = #tpu.dot_dimension_numbers<[1], [0], [0], [1], [0, 0, 1, 1], [], []>} : vector<16x32xbf16>, vector<32x32xbf16>, vector<16x32xf32> -> vector<16x32xf32>
    %102 = vector.broadcast %95 : vector<1x32xf32> to vector<16x32xf32>
    %103 = arith.addf %102, %101 : vector<16x32xf32>
    %cst_43 = arith.constant dense<0.000000e+00> : vector<32xf32>
    %104 = vector.multi_reduction <add>, %103, %cst_43 [0] : vector<16x32xf32> to vector<32xf32>
    %105 = vector.shape_cast %104 : vector<32xf32> to vector<1x32xf32>
    %106 = arith.mulf %103, %103 : vector<16x32xf32>
    %cst_44 = arith.constant dense<0.000000e+00> : vector<32xf32>
    %107 = vector.multi_reduction <add>, %106, %cst_44 [0] : vector<16x32xf32> to vector<32xf32>
    %108 = vector.shape_cast %107 : vector<32xf32> to vector<1x32xf32>
    %cst_45 = arith.constant 6.250000e-02 : f32
    %109 = vector.broadcast %cst_45 : f32 to vector<1x32xf32>
    %110 = arith.mulf %105, %109 : vector<1x32xf32>
    %cst_46 = arith.constant 6.250000e-02 : f32
    %111 = vector.broadcast %cst_46 : f32 to vector<1x32xf32>
    %112 = arith.mulf %108, %111 : vector<1x32xf32>
    %113 = arith.mulf %110, %110 : vector<1x32xf32>
    %114 = arith.subf %112, %113 : vector<1x32xf32>
    %cst_47 = arith.constant 0.000000e+00 : f32
    %115 = vector.broadcast %cst_47 : f32 to vector<1x32xf32>
    %116 = arith.maximumf %114, %115 : vector<1x32xf32>
    %117 = vector.broadcast %110 : vector<1x32xf32> to vector<16x32xf32>
    %118 = arith.subf %103, %117 : vector<16x32xf32>
    %cst_48 = arith.constant 9.99999974E-6 : f32
    %119 = vector.broadcast %cst_48 : f32 to vector<1x32xf32>
    %120 = arith.addf %116, %119 : vector<1x32xf32>
    %121 = math.rsqrt %120 : vector<1x32xf32>
    %122 = vector.broadcast %121 : vector<1x32xf32> to vector<16x32xf32>
    %123 = arith.mulf %118, %122 : vector<16x32xf32>
    %124 = arith.negf %123 : vector<16x32xf32>
    %125 = math.exp %124 : vector<16x32xf32>
    %cst_49 = arith.constant 1.000000e+00 : f32
    %126 = vector.broadcast %cst_49 : f32 to vector<16x32xf32>
    %127 = arith.addf %126, %125 : vector<16x32xf32>
    %128 = arith.divf %126, %127 : vector<16x32xf32>
    %c0_50 = arith.constant 0 : index
    %c0_51 = arith.constant 0 : index
    %129 = vector.load %arg9[%c0_50, %c0_51] : memref<32x32xbf16, #tpu.memory_space<vmem>>, vector<32x32xbf16>
    %130 = arith.truncf %128 : vector<16x32xf32> to vector<16x32xbf16>
    %cst_52 = arith.constant dense<0.000000e+00> : vector<16x32xf32>
    %131 = tpu.matmul %130, %129, %cst_52 {dimension_numbers = #tpu.dot_dimension_numbers<[1], [0], [0], [1], [0, 0, 1, 1], [], []>} : vector<16x32xbf16>, vector<32x32xbf16>, vector<16x32xf32> -> vector<16x32xf32>
    %c0_53 = arith.constant 0 : index
    %c0_54 = arith.constant 0 : index
    %132 = vector.load %arg10[%c0_53, %c0_54] : memref<1x32xf32, #tpu.memory_space<vmem>>, vector<1x32xf32>
    %133 = vector.broadcast %132 : vector<1x32xf32> to vector<16x32xf32>
    %134 = arith.addf %131, %133 : vector<16x32xf32>
    %cst_55 = arith.constant dense<0.000000e+00> : vector<32xf32>
    %135 = vector.multi_reduction <add>, %134, %cst_55 [0] : vector<16x32xf32> to vector<32xf32>
    %136 = vector.shape_cast %135 : vector<32xf32> to vector<1x32xf32>
    %137 = arith.mulf %134, %134 : vector<16x32xf32>
    %cst_56 = arith.constant dense<0.000000e+00> : vector<32xf32>
    %138 = vector.multi_reduction <add>, %137, %cst_56 [0] : vector<16x32xf32> to vector<32xf32>
    %139 = vector.shape_cast %138 : vector<32xf32> to vector<1x32xf32>
    %cst_57 = arith.constant 6.250000e-02 : f32
    %140 = vector.broadcast %cst_57 : f32 to vector<1x32xf32>
    %141 = arith.mulf %136, %140 : vector<1x32xf32>
    %cst_58 = arith.constant 6.250000e-02 : f32
    %142 = vector.broadcast %cst_58 : f32 to vector<1x32xf32>
    %143 = arith.mulf %139, %142 : vector<1x32xf32>
    %144 = arith.mulf %141, %141 : vector<1x32xf32>
    %145 = arith.subf %143, %144 : vector<1x32xf32>
    %cst_59 = arith.constant 0.000000e+00 : f32
    %146 = vector.broadcast %cst_59 : f32 to vector<1x32xf32>
    %147 = arith.maximumf %145, %146 : vector<1x32xf32>
    %148 = vector.broadcast %141 : vector<1x32xf32> to vector<16x32xf32>
    %149 = arith.subf %134, %148 : vector<16x32xf32>
    %cst_60 = arith.constant 9.99999974E-6 : f32
    %150 = vector.broadcast %cst_60 : f32 to vector<1x32xf32>
    %151 = arith.addf %147, %150 : vector<1x32xf32>
    %152 = math.rsqrt %151 : vector<1x32xf32>
    %153 = vector.broadcast %152 : vector<1x32xf32> to vector<16x32xf32>
    %154 = arith.mulf %149, %153 : vector<16x32xf32>
    %155 = arith.negf %154 : vector<16x32xf32>
    %156 = math.exp %155 : vector<16x32xf32>
    %cst_61 = arith.constant 1.000000e+00 : f32
    %157 = vector.broadcast %cst_61 : f32 to vector<16x32xf32>
    %158 = arith.addf %157, %156 : vector<16x32xf32>
    %159 = arith.divf %157, %158 : vector<16x32xf32>
    %cst_62 = arith.constant dense<0.000000e+00> : vector<32xf32>
    %160 = vector.multi_reduction <add>, %159, %cst_62 [0] : vector<16x32xf32> to vector<32xf32>
    %161 = vector.shape_cast %160 : vector<32xf32> to vector<1x32xf32>
    %162 = arith.mulf %159, %159 : vector<16x32xf32>
    %cst_63 = arith.constant dense<0.000000e+00> : vector<32xf32>
    %163 = vector.multi_reduction <add>, %162, %cst_63 [0] : vector<16x32xf32> to vector<32xf32>
    %164 = vector.shape_cast %163 : vector<32xf32> to vector<1x32xf32>
    %cst_64 = arith.constant 6.250000e-02 : f32
    %165 = vector.broadcast %cst_64 : f32 to vector<1x32xf32>
    %166 = arith.mulf %161, %165 : vector<1x32xf32>
    %cst_65 = arith.constant 6.250000e-02 : f32
    %167 = vector.broadcast %cst_65 : f32 to vector<1x32xf32>
    %168 = arith.mulf %164, %167 : vector<1x32xf32>
    %169 = arith.mulf %166, %166 : vector<1x32xf32>
    %170 = arith.subf %168, %169 : vector<1x32xf32>
    %cst_66 = arith.constant 0.000000e+00 : f32
    %171 = vector.broadcast %cst_66 : f32 to vector<1x32xf32>
    %172 = arith.maximumf %170, %171 : vector<1x32xf32>
    %173 = vector.broadcast %166 : vector<1x32xf32> to vector<16x32xf32>
    %174 = arith.subf %159, %173 : vector<16x32xf32>
    %cst_67 = arith.constant 9.99999974E-6 : f32
    %175 = vector.broadcast %cst_67 : f32 to vector<1x32xf32>
    %176 = arith.addf %172, %175 : vector<1x32xf32>
    %177 = math.rsqrt %176 : vector<1x32xf32>
    %178 = vector.broadcast %177 : vector<1x32xf32> to vector<16x32xf32>
    %179 = arith.mulf %174, %178 : vector<16x32xf32>
    %180 = arith.negf %179 : vector<16x32xf32>
    %181 = math.exp %180 : vector<16x32xf32>
    %cst_68 = arith.constant 1.000000e+00 : f32
    %182 = vector.broadcast %cst_68 : f32 to vector<16x32xf32>
    %183 = arith.addf %182, %181 : vector<16x32xf32>
    %184 = arith.divf %182, %183 : vector<16x32xf32>
    %c0_69 = arith.constant 0 : index
    %c0_70 = arith.constant 0 : index
    %185 = vector.load %arg11[%c0_69, %c0_70] : memref<32x32xbf16, #tpu.memory_space<vmem>>, vector<32x32xbf16>
    %186 = arith.truncf %184 : vector<16x32xf32> to vector<16x32xbf16>
    %cst_71 = arith.constant dense<0.000000e+00> : vector<16x32xf32>
    %187 = tpu.matmul %186, %185, %cst_71 {dimension_numbers = #tpu.dot_dimension_numbers<[1], [0], [0], [1], [0, 0, 1, 1], [], []>} : vector<16x32xbf16>, vector<32x32xbf16>, vector<16x32xf32> -> vector<16x32xf32>
    %188 = arith.addf %94, %187 : vector<16x32xf32>
    %c0_72 = arith.constant 0 : index
    %c0_73 = arith.constant 0 : index
    %189 = vector.load %arg12[%c0_72, %c0_73] : memref<1x32xf32, #tpu.memory_space<vmem>>, vector<1x32xf32>
    %190 = vector.broadcast %189 : vector<1x32xf32> to vector<16x32xf32>
    %191 = arith.addf %188, %190 : vector<16x32xf32>
    %c0_74 = arith.constant 0 : index
    %c0_75 = arith.constant 0 : index
    %192 = vector.load %arg13[%c0_74, %c0_75] : memref<16x32xf32, #tpu.memory_space<vmem>>, vector<16x32xf32>
    tpu.vector_store %arg13[%c0_74, %c0_75], %191 {strides = array<i32>} : memref<16x32xf32, #tpu.memory_space<vmem>>, vector<16x32xf32>,
    return
  }
}

</mosaic_0001>

<bundles_post_ra>
// kernel: tpu_custom_call.1
= control target key start
LH: loop header
LB: loop body
LE: loop exit
PB: predicated region body
PF: predicated region fallthrough
CT: control target
= control target key end

     0   :  { %18 = vsyncpa [#allocation3], 0  ;;  %s1473_s0 = inlined_call_operand.hbm [shape: bf16[16,16], index: 0, kind: input, shape index: {}]   ;;  %s1474_s1 = inlined_call_operand.vmem [shape: f32[16,8], index: 1, kind: input, shape index: {}]   ;;  %s1475_s2 = inlined_call_operand.hbm [shape: bf16[8,32], index: 2, kind: input, shape index: {}]   ;;  %s1476_s3 = inlined_call_operand.vmem [shape: f32[1,32], index: 3, kind: input, shape index: {}]   ;;  %s1477_s4 = inlined_call_operand.vmem [shape: bf16[32,32], index: 4, kind: input, shape index: {}]   ;;  %s1478_s5 = inlined_call_operand.hbm [shape: f32[1,32], index: 5, kind: input, shape index: {}]   ;;  %s1479_s6 = inlined_call_operand.vmem [shape: bf16[32,32], index: 6, kind: input, shape index: {}]   ;;  %s1480_s7 = inlined_call_operand.hbm [shape: bf16[32,32], index: 7, kind: input, shape index: {}]   ;;  %s1481_s8 = inlined_call_operand.vmem [shape: f32[1,32], index: 8, kind: input, shape index: {}]   ;;  %s1482_s9 = inlined_call_operand.hbm [shape: bf16[32,32], index: 9, kind: input, shape index: {}]   ;;  %s1483_s10 = inlined_call_operand.vmem [shape: f32[1,32], index: 10, kind: input, shape index: {}]   ;;  %s1484_s11 = inlined_call_operand.hbm [shape: bf16[32,32], index: 11, kind: input, shape index: {}]   ;;  %s1485_s12 = inlined_call_operand.vmem [shape: f32[1,32], index: 12, kind: input, shape index: {}]   ;;  %s1486_s13 = inlined_call_operand.hbm [shape: f32[16,32], index: 13, kind: output, shape index: {}]  }
   0x1   :  { %19 = vsyncpa [#allocation6], 0 }
   0x2   :  { %20 = vsyncpa [#allocation9], 0 }
   0x3   :  { %21 = vsyncpa [#allocation12], 0 }
   0x4   :  { %22 = vsyncpa [#allocation4], 0  ;;  %s1251_s25 = smov [#allocation5]  }
   0x5   :  { %s43_s26 = sshll.u32 %s1251_s25, 4  ;;  %s44_s26 = int_to_ptr.vmem [resolvable:$true] %s43_s26 }
   0x6   :  { %s1109_s27 = scalar_lea.vmem %s44_s26, 64  ;;  %p1114_p1 = scmp.lt.s32.totalorder %s44_s26, %s44_s26 }
   0x7   :  { %p1110_p0 = scmp.ne.s32.totalorder %s44_s26, %s1109_s27  ;;  %p1115_p2 = scmp.lt.s32.totalorder %s1109_s27, %s1109_s27 }
   0x9   :  { %p1116_p3 = por %p1115_p2, %p1114_p1 }
   0xb   :  { %p1117_p4 = pnand %p1116_p3, %p1110_p0 }
   0xd   :  { %1120 = shalt.err (!%p1117_p4)
}
   0xe   :  { %46 = dma.hbm_to_vmem [thread:$0]  %s1475_s2, 64, %s44_s26, [#allocation6]  }
   0xf   :  { %s1252_s30 = smov [#allocation8]   ;;  %s1253_s15 = smov [#allocation2]  }
  0x10   :  { %s68_s14 = sshll.u32 %s1252_s30, 4  ;;  %s28_s16 = sshll.u32 %s1253_s15, 4  ;;  %s69_s14 = int_to_ptr.vmem [resolvable:$true] %s68_s14  ;;  %s29_s16 = int_to_ptr.vmem [resolvable:$true] %s28_s16 }
  0x11   :  { %s1129_s17 = scalar_lea.vmem %s69_s14, 256  ;;  %p1134_p6 = scmp.lt.s32.totalorder %s69_s14, %s69_s14 }
  0x12   :  { %p1130_p5 = scmp.ne.s32.totalorder %s69_s14, %s1129_s17  ;;  %p1135_p7 = scmp.lt.s32.totalorder %s1129_s17, %s1129_s17 }
  0x14   :  { %p1136_p8 = por %p1135_p7, %p1134_p6 }
  0x16   :  { %p1137_p9 = pnand %p1136_p8, %p1130_p5 }
  0x18   :  { %1140 = shalt.err (!%p1137_p9)
}
  0x19   :  { %s1254_s18 = smov 64   ;;  %s1255_s19 = smov 4  }
  0x1a   :  { %74 = dma.hbm_to_vmem [thread:$0]  %s1480_s7, 256, %s69_s14, [#allocation9], %s1254_s18, %s1254_s18, %s1255_s19  }
  0x1b   :  { %s1149_s2 = scalar_lea.vmem %s29_s16, 128  ;;  %p1154_p11 = scmp.lt.s32.totalorder %s29_s16, %s29_s16 }
  0x1c   :  { %p1150_p10 = scmp.ne.s32.totalorder %s29_s16, %s1149_s2  ;;  %p1155_p12 = scmp.lt.s32.totalorder %s1149_s2, %s1149_s2 }
  0x1e   :  { %p1156_p13 = por %p1155_p12, %p1154_p11 }
  0x20   :  { %p1157_p0 = pnand %p1156_p13, %p1150_p10 }
  0x22   :  { %1160 = shalt.err (!%p1157_p0)
}
  0x23   :  { %34 = dma.hbm_to_vmem [thread:$0]  %s1473_s0, 128, %s29_s16, [#allocation3], %s1254_s18, %s1254_s18, %s1255_s19  }
  0x24   :  { %s1256_s24 = smov [#allocation7]   ;;  %s1257_s26 = smov [#allocation10]  }
  0x25   :  { %s57_s25 = sshll.u32 %s1256_s24, 4  ;;  %s82_s7 = sshll.u32 %s1257_s26, 4  ;;  %s58_s25 = int_to_ptr.vmem [resolvable:$true] %s57_s25  ;;  %s83_s7 = int_to_ptr.vmem [resolvable:$true] %s82_s7 }
  0x26   :  { %s1169_s27 = scalar_lea.vmem %s58_s25, 16  ;;  %s1173_s28 = scalar_lea.vmem %s58_s25, 32 }
  0x27   :  { %p1170_p1 = scmp.ne.s32.totalorder %s58_s25, %s1169_s27  ;;  %p1174_p2 = scmp.lt.s32.totalorder %s58_s25, %s58_s25 }
  0x28   :  { %p1175_p3 = scmp.lt.s32.totalorder %s1173_s28, %s1169_s27 }
  0x2a   :  { %p1176_p4 = por %p1175_p3, %p1174_p2 }
  0x2c   :  { %p1177_p5 = pnand %p1176_p4, %p1170_p1 }
  0x2e   :  { %1180 = shalt.err (!%p1177_p5)
}
  0x2f   :  { %60 = dma.hbm_to_vmem [thread:$0]  %s1478_s5, 16, %s58_s25, [#allocation6]  }
  0x30   :  { %s1189_s14 = scalar_lea.vmem %s83_s7, 256  ;;  %p1194_p7 = scmp.lt.s32.totalorder %s83_s7, %s83_s7 }
  0x31   :  { %p1190_p6 = scmp.ne.s32.totalorder %s83_s7, %s1189_s14  ;;  %p1195_p8 = scmp.lt.s32.totalorder %s1189_s14, %s1189_s14 }
  0x33   :  { %p1196_p9 = por %p1195_p8, %p1194_p7 }
  0x35   :  { %p1197_p10 = pnand %p1196_p9, %p1190_p6 }
  0x37   :  { %1200 = shalt.err (!%p1197_p10)
}
  0x38   :  { %88 = dma.hbm_to_vmem [thread:$0]  %s1482_s9, 256, %s83_s7, [#allocation9], %s1254_s18, %s1254_s18, %s1255_s19  }
  0x39   :  { %s1258_s16 = smov [#allocation11]  }
  0x3a   :  { %s96_s17 = sshll.u32 %s1258_s16, 4  ;;  %s97_s17 = int_to_ptr.vmem [resolvable:$true] %s96_s17 }
  0x3b   :  { %s1209_s20 = scalar_lea.vmem %s97_s17, 256  ;;  %p1214_p12 = scmp.lt.s32.totalorder %s97_s17, %s97_s17 }
  0x3c   :  { %p1210_p11 = scmp.ne.s32.totalorder %s97_s17, %s1209_s20  ;;  %p1215_p13 = scmp.lt.s32.totalorder %s1209_s20, %s1209_s20 }
  0x3e   :  { %p1216_p0 = por %p1215_p13, %p1214_p12 }
  0x40   :  { %p1217_p1 = pnand %p1216_p0, %p1210_p11 }
  0x42   :  { %1220 = shalt.err (!%p1217_p1)
}
  0x43   :  { %102 = dma.hbm_to_vmem [thread:$0]  %s1484_s11, 256, %s97_s17, [#allocation12], %s1254_s18, %s1254_s18, %s1255_s19  }
  0x44   :  { %1241 = dma.done.wait [#allocation3], 128  }
  0x45   :  { %1242 = vsyncadd [#allocation3], 4294967168 }
  0x46   :  { %1243 = dma.done.wait [#allocation6], 80  }
  0x47   :  { %1244 = vsyncadd [#allocation6], 4294967216 }
  0x48   :  { %1245 = dma.done.wait [#allocation9], 512  }
  0x49   :  { %1246 = vsyncadd [#allocation9], 4294966784 }
  0x4a   :  { %1247 = dma.done.wait [#allocation12], 256  }
  0x4b   :  { %1248 = vsyncadd [#allocation12], 4294967040  ;;  %v1259_v0 = vmov 0.0   ;;  %vm1260_vm0 = vmmov 0   ;;  %v126_v1 = vld [vmem:[%s1474_s1] sm:$0xff]  ;;  %v127_v2 = vld [vmem:[%s1474_s1 + $0x8] sm:$0xff] }
  0x4c   :  { %959 = vmatprep.subr.bf16.mxu0 %v1259_v0  ;;  %961 = vmatprep.mubr.msk.bf16.mxu0 %vm1260_vm0, %v1259_v0  ;;  %v129_v3 = vpack.c.bf16 %v127_v2, %v126_v1  ;;  %v1376_v4 = vld [vmem:[#allocation2] sm:$0xff]   ;;  %vm135_vm1 = vcmask 130048   ;;  %v182_v5 = vld [vmem:[#allocation5] sm:$0xf]  ;;  %vm188_vm2 = vcmask 1043456   ;;  %vm184_vm3 = vcmask 64512  }
  0x4d   :  { %965 = vmatprep.subr.bf16.mxu1 %v1259_v0  ;;  %967 = vmatprep.mubr.msk.bf16.mxu1 %vm1260_vm0, %v1259_v0  ;;  %v190_v6 = vsel %vm188_vm2, %v182_v5, 0  ;;  %v1031_v14 = vld [vmem:[%s1477_s4 + $0x8] sm:$0xff]   ;;  %v1032_v15 = vld [vmem:[%s1477_s4] sm:$0xff]   ;;  %vm241_vm4 = vcmask 261120   ;;  %s1261_s30 = smov [#allocation13]  }
  0x4e   :  { %960 = vmatpush3.bf16.msra.mxu0 %v129_v3  ;;  %966 = vmatpush3.bf16.msra.mxu1 %v190_v6  ;;  %v905_v16 = vld [vmem:[%s1476_s3] ss:$0 sm:$0xff]  ;;  %v908_v63 = vld [vmem:[#allocation7] ss:$0 sm:$0xff]  ;;  %s887_s14 = sshll.u32 %s1261_s30, 4  ;;  %s888_s14 = int_to_ptr.vmem [resolvable:$true] %s887_s14 }
  0x4f   :  { %971 = vmatprep.subr.bf16.mxu0 %v1259_v0  ;;  %979 = vmatprep.subr.bf16.mxu1 %v1259_v0  ;;  %s1221_s0 = scalar_lea.vmem %s888_s14, 256  ;;  %p1226_p3 = scmp.lt.s32.totalorder %s888_s14, %s888_s14 }
  0x50   :  { %p1222_p2 = scmp.ne.s32.totalorder %s888_s14, %s1221_s0  ;;  %p1227_p4 = scmp.lt.s32.totalorder %s1221_s0, %s1221_s0 }
  0x51   :  { %962 = vmatmul.mubr.msk.bf16.vlgmr.msra.gmra.mxu0 %vm135_vm1, %v1376_v4 }
  0x52   :  { %975 = vmatprep.mubr.msk.bf16.mxu0 %vm1260_vm0, %v1259_v0  ;;  %972 = vmatpush3.bf16.msra.mxu0 %v1031_v14  ;;  %p1228_p5 = por %p1227_p4, %p1226_p3 }
  0x53   :  { %973 = vmatprep.subr.bf16.mxu0 %v1259_v0 }
  0x54   :  { %p1229_p6 = pnand %p1228_p5, %p1222_p2 }
  0x56   :  { %974 = vmatpush3.bf16.msra.mxu0 %v1032_v15 }
  0x57   :  { %985 = vmatprep.subr.bf16.mxu0 %v1259_v0 }
 0x111   :  { %v173_v7 = vpop.f32.mrf.mxu0 }
 0x112   :  { %v180_v10 = vadd.f32 %v173_v7, %v126_v1 }
 0x113   :  { %v963_v8 = vpop.f32.mrf.mxu0 }
 0x115   :  { %v176_v9 = vpop.f32.mrf.mxu0 }
 0x116   :  { %v181_v11 = vadd.f32 %v176_v9, %v127_v2 }
 0x117   :  { %v964_v12 = vpop.f32.mrf.mxu0 }
 0x118   :  { %v183_v13 = vpack.c.bf16 %v181_v11, %v180_v10 }
 0x11a   :  { %968 = vmatmul.mubr.msk.bf16.vlgmr.msra.gmra.mxu1 %vm184_vm3, %v183_v13 }
 0x11b   :  { %981 = vmatprep.mubr.msk.bf16.mxu1 %vm1260_vm0, %v1259_v0 }
 0x1da   :  { %v226_v17 = vpop.f32.mrf.mxu1 }
 0x1db   :  { %v239_v18 = vadd.f32 %v905_v16, %v226_v17 }
 0x1dc   :  { %v969_v19 = vpop.f32.mrf.mxu1 }
 0x1dd   :  { %v251_v21 = vmul.f32 %v239_v18, %v239_v18  ;;  %v242_v24 = vsel %vm241_vm4, %v239_v18, 0.0 }
 0x1de   :  { %v229_v20 = vpop.f32.mrf.mxu1 }
 0x1df   :  { %v240_v22 = vadd.f32 %v905_v16, %v229_v20  ;;  %v253_v28 = vsel %vm241_vm4, %v251_v21, 0.0 }
 0x1e0   :  { %v970_v23 = vpop.f32.mrf.mxu1 }
 0x1e1   :  { %v243_v25 = vsel %vm241_vm4, %v240_v22, 0.0  ;;  %v252_v26 = vmul.f32 %v240_v22, %v240_v22 }
 0x1e2   :  { %v244_v27 = vadd.f32 %v243_v25, %v242_v24 }
 0x1e3   :  { %v254_v29 = vsel %vm241_vm4, %v252_v26, 0.0 }
 0x1e4   :  { %v245_v30 = vrot.slane %v244_v27, 4  ;;  %v255_v31 = vadd.f32 %v254_v29, %v253_v28 }
 0x1e6   :  { %v246_v32 = vadd.f32 %v245_v30, %v244_v27  ;;  %v256_v33 = vrot.slane %v255_v31, 4 }
 0x1e8   :  { %v247_v34 = vrot.slane %v246_v32, 2  ;;  %v257_v35 = vadd.f32 %v256_v33, %v255_v31 }
 0x1ea   :  { %v248_v36 = vadd.f32 %v247_v34, %v246_v32  ;;  %v258_v37 = vrot.slane %v257_v35, 2 }
 0x1ec   :  { %v249_v38 = vrot.slane %v248_v36, 1  ;;  %v259_v39 = vadd.f32 %v258_v37, %v257_v35 }
 0x1ee   :  { %v250_v40 = vadd.f32 %v249_v38, %v248_v36  ;;  %v260_v41 = vrot.slane %v259_v39, 1 }
 0x1f0   :  { %v261_v42 = vadd.f32 %v260_v41, %v259_v39  ;;  %v262_v43 = vmul.f32 0.0625, %v250_v40 }
 0x1f2   :  { %v263_v44 = vmul.f32 0.0625, %v261_v42  ;;  %v264_v45 = vmul.f32 %v262_v43, %v262_v43  ;;  %v267_v49 = vsub.f32 %v239_v18, %v262_v43  ;;  %v268_v50 = vsub.f32 %v240_v22, %v262_v43 }
 0x1f4   :  { %v265_v46 = vsub.f32 %v263_v44, %v264_v45 }
 0x1f6   :  { %v266_v47 = vmax.f32 %v265_v46, 0.0 }
 0x1f8   :  { %v269_v48 = vadd.f32 1e-05, %v266_v47 }
 0x1fa   :  { %1041 = vrsqrt.f32 %v269_v48 }
 0x207   :  { %v1042_v51 = vpop.eup %1041 }
 0x208   :  { %v271_v52 = vmul.f32 %v1042_v51, %v267_v49  ;;  %v272_v53 = vmul.f32 %v1042_v51, %v268_v50 }
 0x20a   :  { %v906_v54 = vmul.f32 -1.442695, %v271_v52  ;;  %v907_v55 = vmul.f32 -1.442695, %v272_v53 }
 0x20c   :  { %1043 = vpow2.f32 %v906_v54 }
 0x20d   :  { %1045 = vpow2.f32 %v907_v55 }
 0x219   :  { %v1044_v56 = vpop.eup %1043 }
 0x21a   :  { %v1046_v57 = vpop.eup %1045  ;;  %v279_v58 = vadd.f32 1.0, %v1044_v56 }
 0x21b   :  { %v280_v59 = vadd.f32 1.0, %v1046_v57 }
 0x21c   :  { %1047 = vrcp.f32 %v279_v58 }
 0x21d   :  { %1049 = vrcp.f32 %v280_v59 }
 0x229   :  { %v1048_v60 = vpop.eup %1047 }
 0x22a   :  { %v1050_v61 = vpop.eup %1049 }
 0x22b   :  { %v289_v62 = vpack.c.bf16 %v1050_v61, %v1048_v60 }
 0x22d   :  { %976 = vmatmul.mubr.msk.bf16.vlgmr.msra.gmra.mxu0 %vm241_vm4, %v289_v62 }
 0x22e   :  { %989 = vmatprep.mubr.msk.bf16.mxu0 %vm1260_vm0, %v1259_v0 }
 0x2ed   :  { %v346_v1 = vpop.f32.mrf.mxu0 }
 0x2ee   :  { %v347_v2 = vadd.f32 %v908_v63, %v346_v1 }
 0x2ef   :  { %v977_v3 = vpop.f32.mrf.mxu0 }
 0x2f0   :  { %v362_v6 = vmul.f32 %v347_v2, %v347_v2  ;;  %v353_v9 = vsel %vm241_vm4, %v347_v2, 0.0 }
 0x2f1   :  { %v349_v5 = vpop.f32.mrf.mxu0 }
 0x2f2   :  { %v350_v7 = vadd.f32 %v908_v63, %v349_v5  ;;  %v364_v13 = vsel %vm241_vm4, %v362_v6, 0.0 }
 0x2f3   :  { %v978_v8 = vpop.f32.mrf.mxu0 }
 0x2f4   :  { %v354_v10 = vsel %vm241_vm4, %v350_v7, 0.0  ;;  %v363_v11 = vmul.f32 %v350_v7, %v350_v7 }
 0x2f5   :  { %v355_v12 = vadd.f32 %v354_v10, %v353_v9 }
 0x2f6   :  { %v365_v14 = vsel %vm241_vm4, %v363_v11, 0.0 }
 0x2f7   :  { %v356_v15 = vrot.slane %v355_v12, 4  ;;  %v366_v16 = vadd.f32 %v365_v14, %v364_v13 }
 0x2f9   :  { %v357_v17 = vadd.f32 %v356_v15, %v355_v12  ;;  %v367_v18 = vrot.slane %v366_v16, 4 }
 0x2fb   :  { %v358_v19 = vrot.slane %v357_v17, 2  ;;  %v368_v20 = vadd.f32 %v367_v18, %v366_v16 }
 0x2fd   :  { %v359_v21 = vadd.f32 %v358_v19, %v357_v17  ;;  %v369_v22 = vrot.slane %v368_v20, 2 }
 0x2ff   :  { %v360_v23 = vrot.slane %v359_v21, 1  ;;  %v370_v24 = vadd.f32 %v369_v22, %v368_v20 }
 0x301   :  { %v361_v25 = vadd.f32 %v360_v23, %v359_v21  ;;  %v371_v26 = vrot.slane %v370_v24, 1 }
 0x303   :  { %v372_v27 = vadd.f32 %v371_v26, %v370_v24  ;;  %v373_v28 = vmul.f32 0.0625, %v361_v25  ;;  %v1033_v25 = vld [vmem:[#allocation8 + $0x8] sm:$0xff]   ;;  %v1034_v26 = vld [vmem:[#allocation8] sm:$0xff]  }
 0x304   :  { %986 = vmatpush3.bf16.msra.mxu0 %v1033_v25  ;;  %v923_v25 = vld [vmem:[%s1483_s10] ss:$0 sm:$0xff] }
 0x305   :  { %v374_v29 = vmul.f32 0.0625, %v372_v27  ;;  %v375_v30 = vmul.f32 %v373_v28, %v373_v28  ;;  %v378_v34 = vsub.f32 %v347_v2, %v373_v28  ;;  %v379_v35 = vsub.f32 %v350_v7, %v373_v28  ;;  %987 = vmatprep.subr.bf16.mxu0 %v1259_v0 }
 0x307   :  { %v376_v31 = vsub.f32 %v374_v29, %v375_v30 }
 0x308   :  { %988 = vmatpush3.bf16.msra.mxu0 %v1034_v26 }
 0x309   :  { %v377_v32 = vmax.f32 %v376_v31, 0.0  ;;  %1001 = vmatprep.subr.bf16.mxu0 %v1259_v0 }
 0x30b   :  { %v380_v33 = vadd.f32 1e-05, %v377_v32 }
 0x30d   :  { %1051 = vrsqrt.f32 %v380_v33 }
 0x31a   :  { %v1052_v36 = vpop.eup %1051 }
 0x31b   :  { %v382_v37 = vmul.f32 %v1052_v36, %v378_v34  ;;  %v383_v38 = vmul.f32 %v1052_v36, %v379_v35  ;;  %v1036_v34 = vld [vmem:[#allocation10] sm:$0xff]  }
 0x31c   :  { %v920_v35 = vld [vmem:[%s1481_s8] ss:$0 sm:$0xff] }
 0x31d   :  { %v912_v39 = vmul.f32 -1.442695, %v382_v37  ;;  %v913_v40 = vmul.f32 -1.442695, %v383_v38 }
 0x31f   :  { %1053 = vpow2.f32 %v912_v39 }
 0x320   :  { %1055 = vpow2.f32 %v913_v40 }
 0x32c   :  { %v1054_v41 = vpop.eup %1053 }
 0x32d   :  { %v1056_v42 = vpop.eup %1055  ;;  %v390_v43 = vadd.f32 1.0, %v1054_v41 }
 0x32e   :  { %v391_v44 = vadd.f32 1.0, %v1056_v42 }
 0x32f   :  { %1057 = vrcp.f32 %v390_v43 }
 0x330   :  { %1059 = vrcp.f32 %v391_v44 }
 0x33c   :  { %v1058_v45 = vpop.eup %1057 }
 0x33d   :  { %v1060_v46 = vpop.eup %1059  ;;  %v405_v47 = vmul.f32 %v1058_v45, %v1058_v45  ;;  %v396_v48 = vsel %vm241_vm4, %v1058_v45, 0.0 }
 0x33e   :  { %v406_v49 = vmul.f32 %v1060_v46, %v1060_v46  ;;  %v397_v50 = vsel %vm241_vm4, %v1060_v46, 0.0 }
 0x33f   :  { %v407_v51 = vsel %vm241_vm4, %v405_v47, 0.0  ;;  %v398_v52 = vadd.f32 %v397_v50, %v396_v48 }
 0x340   :  { %v408_v53 = vsel %vm241_vm4, %v406_v49, 0.0 }
 0x341   :  { %v409_v54 = vadd.f32 %v408_v53, %v407_v51  ;;  %v399_v55 = vrot.slane %v398_v52, 4 }
 0x343   :  { %v400_v56 = vadd.f32 %v399_v55, %v398_v52  ;;  %v410_v57 = vrot.slane %v409_v54, 4 }
 0x345   :  { %v401_v58 = vrot.slane %v400_v56, 2  ;;  %v411_v59 = vadd.f32 %v410_v57, %v409_v54 }
 0x347   :  { %v402_v60 = vadd.f32 %v401_v58, %v400_v56  ;;  %v412_v61 = vrot.slane %v411_v59, 2 }
 0x349   :  { %v403_v62 = vrot.slane %v402_v60, 1  ;;  %v413_v63 = vadd.f32 %v412_v61, %v411_v59 }
 0x34b   :  { %v404_v1 = vadd.f32 %v403_v62, %v402_v60  ;;  %v414_v2 = vrot.slane %v413_v63, 1 }
 0x34d   :  { %v415_v3 = vadd.f32 %v414_v2, %v413_v63  ;;  %v416_v5 = vmul.f32 0.0625, %v404_v1 }
 0x34f   :  { %v417_v6 = vmul.f32 0.0625, %v415_v3  ;;  %v418_v7 = vmul.f32 %v416_v5, %v416_v5  ;;  %v421_v11 = vsub.f32 %v1058_v45, %v416_v5  ;;  %v422_v12 = vsub.f32 %v1060_v46, %v416_v5 }
 0x351   :  { %v419_v8 = vsub.f32 %v417_v6, %v418_v7 }
 0x353   :  { %v420_v9 = vmax.f32 %v419_v8, 0.0 }
 0x355   :  { %v423_v10 = vadd.f32 1e-05, %v420_v9 }
 0x357   :  { %1061 = vrsqrt.f32 %v423_v10 }
 0x364   :  { %v1062_v13 = vpop.eup %1061 }
 0x365   :  { %v425_v14 = vmul.f32 %v1062_v13, %v421_v11  ;;  %v426_v15 = vmul.f32 %v1062_v13, %v422_v12 }
 0x367   :  { %v914_v16 = vmul.f32 -1.442695, %v425_v14  ;;  %v915_v17 = vmul.f32 -1.442695, %v426_v15 }
 0x369   :  { %1063 = vpow2.f32 %v914_v16 }
 0x36a   :  { %1065 = vpow2.f32 %v915_v17 }
 0x376   :  { %v1064_v18 = vpop.eup %1063 }
 0x377   :  { %v1066_v19 = vpop.eup %1065  ;;  %v433_v20 = vadd.f32 1.0, %v1064_v18 }
 0x378   :  { %v434_v21 = vadd.f32 1.0, %v1066_v19  ;;  %v1037_v19 = vld [vmem:[%s1479_s6 + $0x8] sm:$0xff]  }
 0x379   :  { %1067 = vrcp.f32 %v433_v20 }
 0x37a   :  { %1069 = vrcp.f32 %v434_v21  ;;  %v1038_v21 = vld [vmem:[%s1479_s6] sm:$0xff]  }
 0x386   :  { %v1068_v22 = vpop.eup %1067 }
 0x387   :  { %v1070_v23 = vpop.eup %1069 }
 0x388   :  { %v1412_v24 = vpack.c.bf16 %v1070_v23, %v1068_v22 }
 0x38a   :  { %980 = vmatpush3.bf16.msra.mxu1 %v1412_v24 }
 0x38b   :  { %993 = vmatprep.subr.bf16.mxu1 %v1259_v0 }
 0x38d   :  { %982 = vmatmul.mubr.msk.bf16.vlgmr.msra.gmra.mxu1 %vm135_vm1, %v1376_v4  ;;  %v1035_v4 = vld [vmem:[#allocation10 + $0x8] sm:$0xff]  }
 0x38e   :  { %997 = vmatprep.mubr.msk.bf16.mxu1 %vm1260_vm0, %v1259_v0  ;;  %994 = vmatpush3.bf16.msra.mxu1 %v1035_v4 }
 0x38f   :  { %995 = vmatprep.subr.bf16.mxu1 %v1259_v0 }
 0x392   :  { %996 = vmatpush3.bf16.msra.mxu1 %v1036_v34 }
 0x393   :  { %1009 = vmatprep.subr.bf16.mxu1 %v1259_v0 }
 0x44d   :  { %v479_v27 = vpop.f32.mrf.mxu1 }
 0x44e   :  { %v486_v30 = vadd.f32 %v1068_v22, %v479_v27  ;;  %v1039_v22 = vld [vmem:[#allocation11 + $0x8] sm:$0xff]  }
 0x44f   :  { %v983_v28 = vpop.f32.mrf.mxu1 }
 0x451   :  { %v482_v29 = vpop.f32.mrf.mxu1 }
 0x452   :  { %v487_v31 = vadd.f32 %v1070_v23, %v482_v29  ;;  %v1040_v23 = vld [vmem:[#allocation11] sm:$0xff]  }
 0x453   :  { %v984_v32 = vpop.f32.mrf.mxu1 }
 0x454   :  { %v492_v33 = vpack.c.bf16 %v487_v31, %v486_v30 }
 0x456   :  { %990 = vmatmul.mubr.msk.bf16.vlgmr.msra.gmra.mxu0 %vm241_vm4, %v492_v33 }
 0x457   :  { %1005 = vmatprep.mubr.msk.bf16.mxu0 %vm1260_vm0, %v1259_v0  ;;  %1002 = vmatpush3.bf16.msra.mxu0 %v1039_v22 }
 0x458   :  { %1003 = vmatprep.subr.bf16.mxu0 %v1259_v0 }
 0x45b   :  { %1004 = vmatpush3.bf16.msra.mxu0 %v1040_v23 }
 0x516   :  { %v542_v36 = vpop.f32.mrf.mxu0 }
 0x517   :  { %v555_v37 = vadd.f32 %v920_v35, %v542_v36 }
 0x518   :  { %v991_v38 = vpop.f32.mrf.mxu0 }
 0x519   :  { %v566_v40 = vmul.f32 %v555_v37, %v555_v37  ;;  %v557_v43 = vsel %vm241_vm4, %v555_v37, 0.0 }
 0x51a   :  { %v545_v39 = vpop.f32.mrf.mxu0 }
 0x51b   :  { %v556_v41 = vadd.f32 %v920_v35, %v545_v39  ;;  %v568_v47 = vsel %vm241_vm4, %v566_v40, 0.0 }
 0x51c   :  { %v992_v42 = vpop.f32.mrf.mxu0 }
 0x51d   :  { %v558_v44 = vsel %vm241_vm4, %v556_v41, 0.0  ;;  %v567_v45 = vmul.f32 %v556_v41, %v556_v41 }
 0x51e   :  { %v559_v46 = vadd.f32 %v558_v44, %v557_v43 }
 0x51f   :  { %v569_v48 = vsel %vm241_vm4, %v567_v45, 0.0 }
 0x520   :  { %v560_v49 = vrot.slane %v559_v46, 4  ;;  %v570_v50 = vadd.f32 %v569_v48, %v568_v47 }
 0x522   :  { %v561_v51 = vadd.f32 %v560_v49, %v559_v46  ;;  %v571_v52 = vrot.slane %v570_v50, 4 }
 0x524   :  { %v562_v53 = vrot.slane %v561_v51, 2  ;;  %v572_v54 = vadd.f32 %v571_v52, %v570_v50 }
 0x526   :  { %v563_v55 = vadd.f32 %v562_v53, %v561_v51  ;;  %v573_v56 = vrot.slane %v572_v54, 2 }
 0x528   :  { %v564_v57 = vrot.slane %v563_v55, 1  ;;  %v574_v58 = vadd.f32 %v573_v56, %v572_v54 }
 0x52a   :  { %v565_v59 = vadd.f32 %v564_v57, %v563_v55  ;;  %v575_v60 = vrot.slane %v574_v58, 1 }
 0x52c   :  { %v576_v61 = vadd.f32 %v575_v60, %v574_v58  ;;  %v577_v62 = vmul.f32 0.0625, %v565_v59 }
 0x52e   :  { %v578_v63 = vmul.f32 0.0625, %v576_v61  ;;  %v579_v1 = vmul.f32 %v577_v62, %v577_v62  ;;  %v582_v6 = vsub.f32 %v555_v37, %v577_v62  ;;  %v583_v7 = vsub.f32 %v556_v41, %v577_v62 }
 0x530   :  { %v580_v2 = vsub.f32 %v578_v63, %v579_v1 }
 0x532   :  { %v581_v3 = vmax.f32 %v580_v2, 0.0 }
 0x534   :  { %v584_v5 = vadd.f32 1e-05, %v581_v3 }
 0x536   :  { %1071 = vrsqrt.f32 %v584_v5 }
 0x543   :  { %v1072_v8 = vpop.eup %1071 }
 0x544   :  { %v586_v9 = vmul.f32 %v1072_v8, %v582_v6  ;;  %v587_v10 = vmul.f32 %v1072_v8, %v583_v7 }
 0x546   :  { %v921_v11 = vmul.f32 -1.442695, %v586_v9  ;;  %v922_v12 = vmul.f32 -1.442695, %v587_v10 }
 0x548   :  { %1073 = vpow2.f32 %v921_v11 }
 0x549   :  { %1075 = vpow2.f32 %v922_v12 }
 0x555   :  { %v1074_v13 = vpop.eup %1073 }
 0x556   :  { %v1076_v14 = vpop.eup %1075  ;;  %v594_v15 = vadd.f32 1.0, %v1074_v13 }
 0x557   :  { %v595_v16 = vadd.f32 1.0, %v1076_v14 }
 0x558   :  { %1077 = vrcp.f32 %v594_v15 }
 0x559   :  { %1079 = vrcp.f32 %v595_v16 }
 0x565   :  { %v1078_v17 = vpop.eup %1077 }
 0x566   :  { %v1080_v18 = vpop.eup %1079 }
 0x567   :  { %v604_v20 = vpack.c.bf16 %v1080_v18, %v1078_v17 }
 0x569   :  { %998 = vmatmul.mubr.msk.bf16.vlgmr.msra.gmra.mxu1 %vm241_vm4, %v604_v20 }
 0x56a   :  { %1010 = vmatpush3.bf16.msra.mxu1 %v1037_v19  ;;  %1013 = vmatprep.mubr.msk.bf16.mxu1 %vm1260_vm0, %v1259_v0 }
 0x56b   :  { %1011 = vmatprep.subr.bf16.mxu1 %v1259_v0 }
 0x56e   :  { %1012 = vmatpush3.bf16.msra.mxu1 %v1038_v21 }
 0x571   :  { %1014 = vmatmul.mubr.msk.bf16.vlgmr.msra.gmra.mxu1 %vm241_vm4, %v1412_v24 }
 0x629   :  { %v661_v26 = vpop.f32.mrf.mxu1 }
 0x62a   :  { %v662_v27 = vadd.f32 %v923_v25, %v661_v26 }
 0x62b   :  { %v999_v28 = vpop.f32.mrf.mxu1 }
 0x62c   :  { %v677_v30 = vmul.f32 %v662_v27, %v662_v27  ;;  %v668_v33 = vsel %vm241_vm4, %v662_v27, 0.0 }
 0x62d   :  { %v664_v29 = vpop.f32.mrf.mxu1 }
 0x62e   :  { %v665_v31 = vadd.f32 %v923_v25, %v664_v29  ;;  %v679_v0 = vsel %vm241_vm4, %v677_v30, 0.0 }
 0x62f   :  { %v1000_v32 = vpop.f32.mrf.mxu1 }
 0x630   :  { %v669_v24 = vsel %vm241_vm4, %v665_v31, 0.0  ;;  %v678_v4 = vmul.f32 %v665_v31, %v665_v31 }
 0x631   :  { %v670_v34 = vadd.f32 %v669_v24, %v668_v33  ;;  %v1452_v35 = vpop.f32.mrf.mxu1 }
 0x632   :  { %v680_v36 = vsel %vm241_vm4, %v678_v4, 0.0 }
 0x633   :  { %v671_v37 = vrot.slane %v670_v34, 4  ;;  %v681_v38 = vadd.f32 %v680_v36, %v679_v0  ;;  %v1015_v39 = vpop.f32.mrf.mxu1 }
 0x635   :  { %v672_v40 = vadd.f32 %v671_v37, %v670_v34  ;;  %v682_v41 = vrot.slane %v681_v38, 4  ;;  %v1456_v42 = vpop.f32.mrf.mxu1 }
 0x637   :  { %v673_v43 = vrot.slane %v672_v40, 2  ;;  %v683_v44 = vadd.f32 %v682_v41, %v681_v38  ;;  %v1016_v45 = vpop.f32.mrf.mxu1 }
 0x639   :  { %v674_v46 = vadd.f32 %v673_v43, %v672_v40  ;;  %v684_v47 = vrot.slane %v683_v44, 2 }
 0x63b   :  { %v675_v48 = vrot.slane %v674_v46, 1  ;;  %v685_v49 = vadd.f32 %v684_v47, %v683_v44 }
 0x63d   :  { %v676_v50 = vadd.f32 %v675_v48, %v674_v46  ;;  %v686_v51 = vrot.slane %v685_v49, 1 }
 0x63f   :  { %v687_v52 = vadd.f32 %v686_v51, %v685_v49  ;;  %v688_v53 = vmul.f32 0.0625, %v676_v50  ;;  %v937_v51 = vld [vmem:[%s1485_s12] ss:$0 sm:$0xff] }
 0x641   :  { %v689_v54 = vmul.f32 0.0625, %v687_v52  ;;  %v690_v55 = vmul.f32 %v688_v53, %v688_v53  ;;  %v693_v59 = vsub.f32 %v662_v27, %v688_v53  ;;  %v694_v60 = vsub.f32 %v665_v31, %v688_v53 }
 0x643   :  { %v691_v56 = vsub.f32 %v689_v54, %v690_v55 }
 0x645   :  { %v692_v57 = vmax.f32 %v691_v56, 0.0 }
 0x647   :  { %v695_v58 = vadd.f32 1e-05, %v692_v57 }
 0x649   :  { %1081 = vrsqrt.f32 %v695_v58 }
 0x656   :  { %v1082_v61 = vpop.eup %1081 }
 0x657   :  { %v697_v62 = vmul.f32 %v1082_v61, %v693_v59  ;;  %v698_v63 = vmul.f32 %v1082_v61, %v694_v60 }
 0x659   :  { %v927_v1 = vmul.f32 -1.442695, %v697_v62  ;;  %v928_v2 = vmul.f32 -1.442695, %v698_v63 }
 0x65b   :  { %1083 = vpow2.f32 %v927_v1 }
 0x65c   :  { %1085 = vpow2.f32 %v928_v2 }
 0x668   :  { %v1084_v3 = vpop.eup %1083 }
 0x669   :  { %v1086_v5 = vpop.eup %1085  ;;  %v705_v6 = vadd.f32 1.0, %v1084_v3 }
 0x66a   :  { %v706_v7 = vadd.f32 1.0, %v1086_v5 }
 0x66b   :  { %1087 = vrcp.f32 %v705_v6 }
 0x66c   :  { %1089 = vrcp.f32 %v706_v7 }
 0x678   :  { %v1088_v8 = vpop.eup %1087 }
 0x679   :  { %v1090_v9 = vpop.eup %1089  ;;  %v720_v10 = vmul.f32 %v1088_v8, %v1088_v8  ;;  %v711_v11 = vsel %vm241_vm4, %v1088_v8, 0.0 }
 0x67a   :  { %v712_v12 = vsel %vm241_vm4, %v1090_v9, 0.0  ;;  %v721_v13 = vmul.f32 %v1090_v9, %v1090_v9 }
 0x67b   :  { %v722_v14 = vsel %vm241_vm4, %v720_v10, 0.0  ;;  %v713_v15 = vadd.f32 %v712_v12, %v711_v11 }
 0x67c   :  { %v723_v16 = vsel %vm241_vm4, %v721_v13, 0.0 }
 0x67d   :  { %v724_v17 = vadd.f32 %v723_v16, %v722_v14  ;;  %v714_v18 = vrot.slane %v713_v15, 4 }
 0x67f   :  { %v725_v19 = vrot.slane %v724_v17, 4  ;;  %v715_v20 = vadd.f32 %v714_v18, %v713_v15 }
 0x681   :  { %v726_v21 = vadd.f32 %v725_v19, %v724_v17  ;;  %v716_v22 = vrot.slane %v715_v20, 2 }
 0x683   :  { %v717_v23 = vadd.f32 %v716_v22, %v715_v20  ;;  %v727_v25 = vrot.slane %v726_v21, 2 }
 0x685   :  { %v718_v26 = vrot.slane %v717_v23, 1  ;;  %v728_v27 = vadd.f32 %v727_v25, %v726_v21 }
 0x687   :  { %v719_v28 = vadd.f32 %v718_v26, %v717_v23  ;;  %v729_v29 = vrot.slane %v728_v27, 1 }
 0x689   :  { %v730_v30 = vadd.f32 %v729_v29, %v728_v27  ;;  %v731_v31 = vmul.f32 0.0625, %v719_v28 }
 0x68b   :  { %v732_v32 = vmul.f32 0.0625, %v730_v30  ;;  %v733_v33 = vmul.f32 %v731_v31, %v731_v31  ;;  %v736_v0 = vsub.f32 %v1088_v8, %v731_v31  ;;  %v737_v36 = vsub.f32 %v1090_v9, %v731_v31 }
 0x68d   :  { %v734_v24 = vsub.f32 %v732_v32, %v733_v33 }
 0x68f   :  { %v735_v4 = vmax.f32 %v734_v24, 0.0 }
 0x691   :  { %v738_v34 = vadd.f32 1e-05, %v735_v4 }
 0x693   :  { %1091 = vrsqrt.f32 %v738_v34 }
 0x6a0   :  { %v1092_v37 = vpop.eup %1091 }
 0x6a1   :  { %v740_v38 = vmul.f32 %v1092_v37, %v736_v0  ;;  %v741_v39 = vmul.f32 %v1092_v37, %v737_v36 }
 0x6a3   :  { %v929_v40 = vmul.f32 -1.442695, %v740_v38  ;;  %v930_v41 = vmul.f32 -1.442695, %v741_v39 }
 0x6a5   :  { %1093 = vpow2.f32 %v929_v40 }
 0x6a6   :  { %1095 = vpow2.f32 %v930_v41 }
 0x6b2   :  { %v1094_v43 = vpop.eup %1093 }
 0x6b3   :  { %v1096_v44 = vpop.eup %1095  ;;  %v748_v45 = vadd.f32 1.0, %v1094_v43 }
 0x6b4   :  { %v749_v46 = vadd.f32 1.0, %v1096_v44 }
 0x6b5   :  { %1097 = vrcp.f32 %v748_v45 }
 0x6b6   :  { %1099 = vrcp.f32 %v749_v46 }
 0x6c2   :  { %v1098_v47 = vpop.eup %1097 }
 0x6c3   :  { %v1100_v48 = vpop.eup %1099 }
 0x6c4   :  { %v758_v49 = vpack.c.bf16 %v1100_v48, %v1098_v47 }
 0x6c6   :  { %1006 = vmatmul.mubr.msk.bf16.vlgmr.msra.gmra.mxu0 %vm241_vm4, %v758_v49 }
 0x786   :  { %v808_v50 = vpop.f32.mrf.mxu0 }
 0x787   :  { %v865_v52 = vadd.f32 %v1452_v35, %v808_v50 }
 0x788   :  { %v1007_v53 = vpop.f32.mrf.mxu0 }
 0x789   :  { %v878_v54 = vadd.f32 %v937_v51, %v865_v52 }
 0x78a   :  { %v811_v55 = vpop.f32.mrf.mxu0 }
 0x78b   :  { %880 = vst.msk [vmem:[#allocation13] sm:$0xff] %vm241_vm4, %v878_v54  ;;  %v868_v56 = vadd.f32 %v1456_v42, %v811_v55 }
 0x78c   :  { %v1008_v57 = vpop.f32.mrf.mxu0 }
 0x78d   :  { %v879_v58 = vadd.f32 %v937_v51, %v868_v56 }
 0x78f   :  { %881 = vst.msk [vmem:[#allocation13 + $0x8] sm:$0xff] %vm241_vm4, %v879_v58 }
 0x790   :  { %1232 = shalt.err (!%p1229_p6)
}
 0x791   :  { %s1262_s12 = smov 128   ;;  %s1263_s15 = smov 8  }
 0x792   :  { %893 = dma.vmem_to_hbm [thread:$0]  %s888_s14, 256, %s1486_s13, [#allocation4], %s1262_s12, %s1262_s12, %s1263_s15  }
 0x793   :  { %1249 = dma.done.wait [#allocation4], 256  }
 0x794   :  { %1250 = vsyncadd [#allocation4], 4294967040 }
 0x795   :  { %897 = vsyncpa [#allocation3], 1 }
 0x796   :  { %898 = vsyncpa [#allocation6], 1 }
 0x797   :  { %899 = vsyncpa [#allocation9], 1 }
 0x798   :  { %900 = vsyncpa [#allocation12], 1 }
 0x799   :  { %901 = vsyncpa [#allocation4], 1 }

</bundles_post_ra>
